<compile_context>
chip_gen: v5e
topology: v5e:2x2
jax: 0.10.0
libtpu: 0.0.40
codegen_flags: <defaults>
</compile_context>

<pallas_src>
import functools

import jax
import jax.numpy as jnp
from jax import lax
from jax.experimental import pallas as pl
from jax.experimental.pallas import tpu as pltpu


def _round_up(n, m):
    return ((n + m - 1) // m) * m


def _cdiv(a, b):
    return (a + b - 1) // b


def _dual_conv_lif_kernel(x_ref, w_ref, o_ref, *, offsets, n_out, thr_eff):
    """Fused 'same' conv (tap-stacked single matmul) + DualLIF threshold.

    x_ref : [TB, Cin, L_img]   TB zero-padded, flattened, halo'd images (bf16)
    w_ref : [Cout, KKC_pad]    combined weights 0.5*(w_fast+w_slow), tap-major (bf16)
    o_ref : [TB, Cout, n_out]  merged spikes on the padded spatial grid (bf16)
    """
    tb, cin, _ = x_ref.shape
    kkc = len(offsets) * cin
    kkc_pad = w_ref.shape[1]
    w = w_ref[...]                                          # [Cout, KKC_pad]
    zpad = (jnp.zeros((kkc_pad - kkc, n_out), x_ref.dtype)
            if kkc_pad > kkc else None)

    def compute(t):
        xi = x_ref[t]                                       # [Cin, L_img]
        # VMEM-local im2col from K*K static lane slices ("flat tap shifts").
        pieces = [xi[:, s:s + n_out] for s in offsets]      # K*K x [Cin, n_out]
        if zpad is not None:
            pieces.append(zpad)
        slab = jnp.concatenate(pieces, axis=0)              # [KKC_pad, n_out]
        # One MXU matmul per image: [Cout, KKC] x [KKC, n_out] (n_out % 128 == 0).
        acc = jnp.dot(w, slab, preferred_element_type=jnp.float32)
        # Single Euler LIF step from v=0: v = (dt/tau)*I, spike = v >= threshold.
        # Merged fast/slow spikes == one compare against the folded threshold.
        o_ref[t] = (acc >= thr_eff).astype(o_ref.dtype)

    if tb == 1:
        compute(0)
    else:
        @pl.loop(0, tb)
        def _(t):
            compute(t)


def _pick_tb(batch, cap):
    if batch < 2:
        return 1
    # Keep >= 2 grid steps so both v7x TensorCores get work; cap the block size.
    return max(1, min(cap, batch // 2))


def dual_conv_lif_forward(x, w_fast, w_slow, *, stride=1, padding=None,
                          tau_fast=0.005, tau_slow=0.1, dt=0.001,
                          threshold=0.5, compute_dtype=jnp.bfloat16,
                          out_dtype=jnp.float32, tb_cap=128):
    """Forward pass matching DualConvLIF.forward (eval path: recon_loss == 0.0).

    Args:
      x:       [B, C_in, H, W]  (NCHW, like PyTorch)
      w_fast:  [C_out, C_in, K, K]
      w_slow:  [C_out, C_in, K, K]
    Returns:
      (spikes [B, C_out, H, W] out_dtype, recon_loss)
    """
    B, Cin, H, W = x.shape
    Cout, Cin_w, K, K2 = w_fast.shape
    assert Cin_w == Cin and K == K2 and w_slow.shape == w_fast.shape
    pad = K // 2 if padding is None else int(padding)
    if stride != 1 or pad != K // 2:
        # TODO(synk): only stride=1, padding=kernel_size//2 ('same') -- the
        # module's defaults -- are implemented.
        raise NotImplementedError("only stride=1 with 'same' padding supported")
    if not (dt > 0.0 and tau_fast > 0.0 and tau_slow > 0.0):
        # TODO(synk): the single-compare OR-fold assumes dt, tau_* > 0.
        raise NotImplementedError("dt and tau_* must be positive")

    Hp, Wp = H + 2 * pad, W + 2 * pad
    HWp = Hp * Wp
    HWp_pad = _round_up(HWp, 128)            # lane-dense matmul N / output dim
    halo = pad * Wp + pad                    # max |flat tap shift|

    # Realize the flat base offset (>= halo) purely with extra zero rows so a
    # single jnp.pad builds ring + halo + tail slack in one HBM pass.
    extra_top = _cdiv(halo, Wp) if halo else 0
    base = extra_top * Wp
    need_rows = _cdiv(base + HWp_pad + halo, Wp)
    extra_bot = max(0, need_rows - (H + 2 * pad + extra_top))
    Htot = H + 2 * pad + extra_top + extra_bot
    L_img = Htot * Wp                        # per-image flat lane length

    tb = _pick_tb(B, tb_cap)
    grid = _cdiv(B, tb)
    B_pad = grid * tb

    # Cast FIRST (halves pad bytes), then ONE pad: batch + ring + halo + tail.
    xb = x.astype(compute_dtype)
    xf = jnp.pad(xb, ((0, B_pad - B), (0, 0),
                      (pad + extra_top, pad + extra_bot), (pad, pad)))
    xf = xf.reshape(B_pad, Cin, L_img)       # [B_pad, Cin, L_img]  (Cin unpadded)

    # Fold pathways: (conv_fast(x)+conv_slow(x))/2 == conv(x, w_comb); weights
    # as one 2-D lhs tile [Cout, K*K*Cin(+pad)], tap-major to match the slab.
    KKC = K * K * Cin
    KKC_pad = _round_up(KKC, 8)
    w_comb = 0.5 * (w_fast.astype(jnp.float32) + w_slow.astype(jnp.float32))
    w2d = jnp.transpose(w_comb, (0, 2, 3, 1)).reshape(Cout, KKC)
    w2d = jnp.pad(w2d, ((0, 0), (0, KKC_pad - KKC))).astype(compute_dtype)

    # spike_fast OR spike_slow  <=>  I >= min(th*tau_fast, th*tau_slow) / dt
    thr_eff = float(min(threshold * tau_fast / dt, threshold * tau_slow / dt))

    offsets = tuple(base + (kh - pad) * Wp + (kw - pad)
                    for kh in range(K) for kw in range(K))

    kernel = functools.partial(_dual_conv_lif_kernel, offsets=offsets,
                               n_out=HWp_pad, thr_eff=thr_eff)

    isz = jnp.dtype(compute_dtype).itemsize
    cost = pl.CostEstimate(
        flops=2 * B_pad * Cout * KKC * HWp_pad,
        transcendentals=0,
        bytes_accessed=(B_pad * Cin * L_img + Cout * KKC_pad
                        + B_pad * Cout * HWp_pad) * isz)

    out = pl.pallas_call(
        kernel,
        out_shape=jax.ShapeDtypeStruct((B_pad, Cout, HWp_pad), compute_dtype),
        grid_spec=pltpu.PrefetchScalarGridSpec(
            num_scalar_prefetch=0,
            grid=(grid,),
            in_specs=[
                # TB images per grid step.
                pl.BlockSpec((tb, Cin, L_img), lambda g: (g, 0, 0)),
                # Combined 2-D weight lhs, resident across the grid.
                pl.BlockSpec((Cout, KKC_pad), lambda g: (0, 0)),
            ],
            out_specs=pl.BlockSpec((tb, Cout, HWp_pad), lambda g: (g, 0, 0)),
        ),
        compiler_params=pltpu.CompilerParams(
            dimension_semantics=("parallel",)),   # shard image blocks across TCs
        cost_estimate=cost,
    )(xf, w2d)

    # One fused crop/cast pass: drop lane padding + pad ring, back to NCHW.
    spikes = out[:B, :, :HWp].reshape(B, Cout, Hp, Wp)[
        :, :, pad:pad + H, pad:pad + W].astype(out_dtype)
    recon_loss = 0.0  # self.training and enable_learning are False by default
    return spikes, recon_loss


if __name__ == "__main__":
    key = jax.random.PRNGKey(0)
    kx, kf, ks = jax.random.split(key, 3)

    B, Cin, H, W = 2, 4, 16, 16
    Cout, K = 8, 3

    x = jax.random.normal(kx, (B, Cin, H, W), dtype=jnp.float32)

    # Deterministic Conv2d-style init: U[-1/sqrt(fan_in), 1/sqrt(fan_in)].
    bound = 1.0 / (Cin * K * K) ** 0.5
    w_fast = jax.random.uniform(kf, (Cout, Cin, K, K), jnp.float32, -bound, bound)
    w_slow = jax.random.uniform(ks, (Cout, Cin, K, K), jnp.float32, -bound, bound)

    fwd = jax.jit(dual_conv_lif_forward)
    spikes, recon_loss = fwd(x, w_fast, w_slow)
    spikes = jax.block_until_ready(spikes)

    assert spikes.shape == (B, Cout, H, W), spikes.shape
    assert spikes.dtype == jnp.float32
    assert bool(jnp.all((spikes == 0.0) | (spikes == 1.0)))

    # Reference check: same bf16 rounding of inputs/weights, f32 conv, same
    # folded threshold; only compare spikes whose pre-activation is clearly
    # away from the threshold (accumulation-order robustness).
    thr_eff = min(0.5 * 0.005 / 0.001, 0.5 * 0.1 / 0.001)
    xq = x.astype(jnp.bfloat16).astype(jnp.float32)
    wq = (0.5 * (w_fast + w_slow)).astype(jnp.bfloat16).astype(jnp.float32)
    pre = lax.conv_general_dilated(
        xq, wq, window_strides=(1, 1), padding="SAME",
        dimension_numbers=("NCHW", "OIHW", "NCHW"),
        precision=lax.Precision.HIGHEST)
    ref = pre >= thr_eff
    decided = jnp.abs(pre - thr_eff) > 1e-3
    ok = bool(jnp.all(jnp.where(decided, (spikes > 0.5) == ref, True)))
    assert ok, "kernel spikes disagree with reference conv+threshold"

    print("KERNEL_OK")
</pallas_src>

<mosaic_0001>
module attributes {stable_mosaic.version = 11 : i64} {
  func.func @_dual_conv_lif_kernel(%arg0: i32, %arg1: memref<1x4x450xbf16, #tpu.memory_space<vmem>>, %arg2: memref<8x40xbf16, #tpu.memory_space<vmem>>, %arg3: memref<1x8x384xbf16, #tpu.memory_space<vmem>>) attributes {dimension_semantics = [#tpu.dimension_semantics<parallel>], iteration_bounds = array<i64: 2>, scalar_prefetch = 0 : i64, scratch_operands = 0 : i64, tpu.core_type = #tpu.core_type<tc>, window_params = [{transform_indices = @transform_0, window_bounds = array<i64: 1, 4, 450>}, {pipeline_mode = #tpu.pipeline_mode<synchronous>, transform_indices = @transform_1, window_bounds = array<i64: 8, 40>}, {transform_indices = @transform_2, window_bounds = array<i64: 1, 8, 384>}]} {
    %c0 = arith.constant 0 : index
    %c0_0 = arith.constant 0 : index
    %0 = vector.load %arg2[%c0, %c0_0] : memref<8x40xbf16, #tpu.memory_space<vmem>>, vector<8x40xbf16>
    %cst = arith.constant 0.000000e+00 : bf16
    %1 = vector.broadcast %cst : bf16 to vector<4x384xbf16>
    %c0_1 = arith.constant 0 : index
    %c0_2 = arith.constant 0 : index
    %c0_3 = arith.constant 0 : index
    %2 = vector.load %arg1[%c0_1, %c0_2, %c0_3] : memref<1x4x450xbf16, #tpu.memory_space<vmem>>, vector<1x4x450xbf16>
    %3 = vector.shape_cast %2 : vector<1x4x450xbf16> to vector<4x450xbf16>
    %4 = vector.extract_strided_slice %3 {offsets = [0, 17], sizes = [4, 384], strides = [1, 1]} : vector<4x450xbf16> to vector<4x384xbf16>
    %5 = vector.extract_strided_slice %3 {offsets = [0, 18], sizes = [4, 384], strides = [1, 1]} : vector<4x450xbf16> to vector<4x384xbf16>
    %6 = vector.extract_strided_slice %3 {offsets = [0, 19], sizes = [4, 384], strides = [1, 1]} : vector<4x450xbf16> to vector<4x384xbf16>
    %7 = vector.extract_strided_slice %3 {offsets = [0, 35], sizes = [4, 384], strides = [1, 1]} : vector<4x450xbf16> to vector<4x384xbf16>
    %8 = vector.extract_strided_slice %3 {offsets = [0, 36], sizes = [4, 384], strides = [1, 1]} : vector<4x450xbf16> to vector<4x384xbf16>
    %9 = vector.extract_strided_slice %3 {offsets = [0, 37], sizes = [4, 384], strides = [1, 1]} : vector<4x450xbf16> to vector<4x384xbf16>
    %10 = vector.extract_strided_slice %3 {offsets = [0, 53], sizes = [4, 384], strides = [1, 1]} : vector<4x450xbf16> to vector<4x384xbf16>
    %11 = vector.extract_strided_slice %3 {offsets = [0, 54], sizes = [4, 384], strides = [1, 1]} : vector<4x450xbf16> to vector<4x384xbf16>
    %12 = vector.extract_strided_slice %3 {offsets = [0, 55], sizes = [4, 384], strides = [1, 1]} : vector<4x450xbf16> to vector<4x384xbf16>
    %13 = tpu.concatenate %4, %5, %6, %7, %8, %9, %10, %11, %12, %1 in 0 : vector<4x384xbf16>, vector<4x384xbf16>, vector<4x384xbf16>, vector<4x384xbf16>, vector<4x384xbf16>, vector<4x384xbf16>, vector<4x384xbf16>, vector<4x384xbf16>, vector<4x384xbf16>, vector<4x384xbf16> -> vector<40x384xbf16>
    %cst_4 = arith.constant dense<0.000000e+00> : vector<8x384xf32>
    %14 = tpu.matmul %0, %13, %cst_4 {dimension_numbers = #tpu.dot_dimension_numbers<[1], [0], [0], [1], [0, 0, 1, 1], [], []>} : vector<8x40xbf16>, vector<40x384xbf16>, vector<8x384xf32> -> vector<8x384xf32>
    %cst_5 = arith.constant 2.500000e+00 : f32
    %15 = vector.broadcast %cst_5 : f32 to vector<8x384xf32>
    %16 = arith.cmpf oge, %14, %15 : vector<8x384xf32>
    %17 = arith.extui %16 : vector<8x384xi1> to vector<8x384xi32>
    %18 = arith.sitofp %17 : vector<8x384xi32> to vector<8x384xf32>
    %19 = arith.truncf %18 : vector<8x384xf32> to vector<8x384xbf16>
    %c0_6 = arith.constant 0 : index
    %c0_7 = arith.constant 0 : index
    %c0_8 = arith.constant 0 : index
    %20 = vector.load %arg3[%c0_6, %c0_7, %c0_8] : memref<1x8x384xbf16, #tpu.memory_space<vmem>>, vector<1x8x384xbf16>
    %21 = vector.shape_cast %20 : vector<1x8x384xbf16> to vector<8x384xbf16>
    %22 = vector.shape_cast %19 : vector<8x384xbf16> to vector<1x8x384xbf16>
    tpu.vector_store %arg3[%c0_6, %c0_7, %c0_8], %22 {strides = array<i32>} : memref<1x8x384xbf16, #tpu.memory_space<vmem>>, vector<1x8x384xbf16>,
    return
  }
  func.func @transform_0(%arg0: i32) -> (i32, i32, i32) {
    %c0_i32 = arith.constant 0 : i32
    %c0_i32_0 = arith.constant 0 : i32
    %c0_i32_1 = arith.constant 0 : i32
    return %arg0, %c0_i32, %c0_i32_0 : i32, i32, i32
  }
  func.func @transform_1(%arg0: i32) -> (i32, i32) {
    %c0_i32 = arith.constant 0 : i32
    %c0_i32_0 = arith.constant 0 : i32
    %c0_i32_1 = arith.constant 0 : i32
    return %c0_i32, %c0_i32_0 : i32, i32
  }
  func.func @transform_2(%arg0: i32) -> (i32, i32, i32) {
    %c0_i32 = arith.constant 0 : i32
    %c0_i32_0 = arith.constant 0 : i32
    %c0_i32_1 = arith.constant 0 : i32
    return %arg0, %c0_i32, %c0_i32_0 : i32, i32, i32
  }
}

</mosaic_0001>

<bundles_post_ra>
// kernel: dual_conv_lif_forward.1
= control target key start
LH: loop header
LB: loop body
LE: loop exit
PB: predicated region body
PF: predicated region fallthrough
CT: control target
= control target key end

     0   :  { %s632_s9 = smov 0   ;;  %s797_s0 = inlined_call_operand.vmem [shape: bf16[2,4,450], index: 0, kind: input, shape index: {}]   ;;  %s798_s1 = inlined_call_operand.vmem [shape: bf16[8,40], index: 1, kind: input, shape index: {}]   ;;  %s799_s2 = inlined_call_operand.vmem [shape: bf16[2,8,384], index: 2, kind: output, shape index: {}]  }
   0x1 LB: > { %s563_s10 = sadd.s32 4294967295, %s605_s9   ;;  %p567_p0 = scmp.ge.s32.totalorder %s605_s9, 1  ;;  %s605_s9 = sphi %s632_s9, %s12_s9  }
   0x2   : > { %p112_p1 = scmp.lt.s32.totalorder %s605_s9, 3 }
   0x4   : > { %p113_p2 = pnand %p567_p0, %p112_p1 }
   0x5   : > { %p134_p3 = scmp.lt.s32.totalorder (!%p113_p2), %s563_s10, 1  ;;  %s607_s15 = smov (!%p113_p2), 127  }
   0x6   : > { %116 = sbr.rel (%p113_p2) target bundleno = 503 (0x1f7), region = 28  ;;  %s608_s16 = smov (!%p113_p2), 126  }
   0x7   : > { %s609_s17 = smov (!%p113_p2), 110   ;;  %s610_s18 = smov (!%p113_p2), 109  }
   0x8   : > { %s611_s19 = smov (!%p113_p2), 108   ;;  %s612_s20 = smov (!%p113_p2), 92  }
   0x9   : > { %s613_s21 = smov (!%p113_p2), 91   ;;  %s614_s22 = smov (!%p113_p2), 90  }
   0xa   : > { %s615_s23 = smov (!%p113_p2), 111  }
   0xb   : > { %s801_s10 = smov (!%p134_p3, %s563_s10), 1  ;;  %vm327_vm0 = vcmask 1041408   ;;  %vm345_vm1 = vcmask 1045504   ;;  %vm171_vm2 = vcmask 1039360   ;;  %vm336_vm3 = vcmask 1043456  }
   0xc   : > { %s579_s11 = sshll.u32 %s801_s10, 3  ;;  %vm193_vm4 = vcmask 1031168   ;;  %vm215_vm5 = vcmask 900096   ;;  %vm258_vm6 = vcmask 883712   ;;  %vm236_vm7 = vcmask 891904   ;;  %s580_s26 = smul.u32 12, %s801_s10 }
   0xd   : > { %s138_s14 = scalar_lea.vmem %s797_s0, %s579_s11  ;;  %vm280_vm8 = vcmask 752640   ;;  %vm302_vm9 = vcmask 744448   ;;  %vm323_vm10 = vcmask 736256   ;;  %vm427_vm11 = vcmask 908288  }
   0xe   : > { %v646_v0 = vld [vmem:[%s138_s14] sm:$0xff]  ;;  %vm443_vm12 = vcmask 326656   ;;  %s143_s29 = scalar_lea.vmem %s799_s2, %s580_s26 }
   0xf   : > { %148 = vst [vmem:[#allocation1] ss:$4 sm:$0xff] %v646_v0 }
  0x16   : > { %v649_v1 = vld.sshfl [vmem:[#allocation1] sm:$0xff pattern:$0x73625140]  ;;  %v651_v2 = vld.sshfl [vmem:[#allocation1 + $0x8] sm:$0xff pattern:$0x73625140] }
  0x17   : > { %v653_v3 = vld.sshfl [vmem:[#allocation1 + $0x10] sm:$0xff pattern:$0x73625140]  ;;  %v655_v4 = vld.sshfl [vmem:[#allocation1 + $0x18] sm:$0xff pattern:$0x73625140] }
  0x18   : > { %154 = vst [vmem:[#allocation1 + $0x1] ss:$4 sm:$0xff] %v646_v0 }
  0x1f   : > { %v159_v5 = vld.sshfl [vmem:[#allocation1 + $0x10] sm:$0xff pattern:$0x73625140]  ;;  %v161_v6 = vld.sshfl [vmem:[#allocation1 + $0x18] sm:$0xff pattern:$0x73625140] }
  0x20   : > { %167 = vrot.lane.b32.xlu0 %v159_v5, %s607_s15  ;;  %169 = vrot.lane.b32.xlu1 %v161_v6, %s607_s15  ;;  %v155_v7 = vld.sshfl [vmem:[#allocation1] sm:$0xff pattern:$0x73625140]  ;;  %v660_v8 = vld.sshfl [vmem:[#allocation1 + $0x8] sm:$0xff pattern:$0x73625140] }
  0x21   : > { %163 = vrot.lane.b32.xlu2 %v155_v7, %s607_s15  ;;  %176 = vst [vmem:[#allocation1 + $0x2] ss:$4 sm:$0xff] %v646_v0 }
  0x28   : > { %v664_v9 = vld.sshfl [vmem:[#allocation1] sm:$0xff pattern:$0x73625140]  ;;  %v666_v10 = vld.sshfl [vmem:[#allocation1 + $0x8] sm:$0xff pattern:$0x73625140] }
  0x29   : > { %v183_v11 = vld.sshfl [vmem:[#allocation1 + $0x18] sm:$0xff pattern:$0x73625140]  ;;  %v181_v12 = vld.sshfl [vmem:[#allocation1 + $0x10] sm:$0xff pattern:$0x73625140] }
  0x2a   : > { %191 = vrot.lane.b32.xlu0 %v183_v11, %s608_s16  ;;  %189 = vrot.lane.b32.xlu2 %v181_v12, %s608_s16  ;;  %198 = vst [vmem:[#allocation1 + $0x3] ss:$4 sm:$0xff] %v646_v0 }
  0x31   : > { %v203_v13 = vld.sshfl [vmem:[#allocation1 + $0x10] sm:$0xff pattern:$0x73625140]  ;;  %v199_v14 = vld.sshfl [vmem:[#allocation1] sm:$0xff pattern:$0x73625140] }
  0x32   : > { %211 = vrot.lane.b32.xlu1 %v203_v13, %s609_s17  ;;  %v201_v15 = vld.sshfl [vmem:[#allocation1 + $0x8] sm:$0xff pattern:$0x73625140]  ;;  %v205_v16 = vld.sshfl [vmem:[#allocation1 + $0x18] sm:$0xff pattern:$0x73625140] }
  0x33   : > { %213 = vrot.lane.b32.xlu2 %v205_v16, %s609_s17  ;;  %219 = vst [vmem:[#allocation1] ss:$4 sm:$0xff] %v646_v0 }
  0x3a   : > { %v222_v17 = vld.sshfl [vmem:[#allocation1 + $0x8] sm:$0xff pattern:$0x73625140]  ;;  %v224_v18 = vld.sshfl [vmem:[#allocation1 + $0x10] sm:$0xff pattern:$0x73625140] }
  0x3b   : > { %232 = vrot.lane.b32.xlu1 %v224_v18, %s610_s18  ;;  %v220_v19 = vld.sshfl [vmem:[#allocation1] sm:$0xff pattern:$0x73625140]  ;;  %v226_v20 = vld.sshfl [vmem:[#allocation1 + $0x18] sm:$0xff pattern:$0x73625140] }
  0x3c   : > { %228 = vrot.lane.b32.xlu0 %v220_v19, %s610_s18  ;;  %241 = vst [vmem:[#allocation1 + $0x1] ss:$4 sm:$0xff] %v646_v0 }
  0x43   : > { %234 = vrot.lane.b32.xlu1 %v226_v20, %s610_s18  ;;  %v242_v21 = vld.sshfl [vmem:[#allocation1] sm:$0xff pattern:$0x73625140]  ;;  %v246_v22 = vld.sshfl [vmem:[#allocation1 + $0x10] sm:$0xff pattern:$0x73625140] }
  0x44   : > { %254 = vrot.lane.b32.xlu2 %v246_v22, %s611_s19  ;;  %v244_v23 = vld.sshfl [vmem:[#allocation1 + $0x8] sm:$0xff pattern:$0x73625140]  ;;  %v248_v24 = vld.sshfl [vmem:[#allocation1 + $0x18] sm:$0xff pattern:$0x73625140] }
  0x45   : > { %252 = vrot.lane.b32.xlu0 %v244_v23, %s611_s19  ;;  %263 = vst [vmem:[#allocation1 + $0x2] ss:$4 sm:$0xff] %v646_v0 }
  0x4b   : > { %230 = vrot.lane.b32.xlu1 %v222_v17, %s610_s18 }
  0x4c   : > { %256 = vrot.lane.b32.xlu2 %v248_v24, %s611_s19  ;;  %v264_v25 = vld.sshfl [vmem:[#allocation1] sm:$0xff pattern:$0x73625140]  ;;  %v266_v26 = vld.sshfl [vmem:[#allocation1 + $0x8] sm:$0xff pattern:$0x73625140] }
  0x4d   : > { %v268_v27 = vld.sshfl [vmem:[#allocation1 + $0x10] sm:$0xff pattern:$0x73625140]  ;;  %v270_v28 = vld.sshfl [vmem:[#allocation1 + $0x18] sm:$0xff pattern:$0x73625140] }
  0x4e   : > { %276 = vrot.lane.b32.xlu0 %v268_v27, %s612_s20  ;;  %285 = vst [vmem:[#allocation1 + $0x3] ss:$4 sm:$0xff] %v646_v0 }
  0x53   : > { %278 = vrot.lane.b32.xlu1 %v270_v28, %s612_s20 }
  0x54   : > { %250 = vrot.lane.b32.xlu2 %v242_v21, %s611_s19 }
  0x55   : > { %v292_v29 = vld.sshfl [vmem:[#allocation1 + $0x18] sm:$0xff pattern:$0x73625140]  ;;  %v286_v30 = vld.sshfl [vmem:[#allocation1] sm:$0xff pattern:$0x73625140] }
  0x56   : > { %300 = vrot.lane.b32.xlu0 %v292_v29, %s613_s21  ;;  %v290_v31 = vld.sshfl [vmem:[#allocation1 + $0x10] sm:$0xff pattern:$0x73625140]  ;;  %v288_v32 = vld.sshfl [vmem:[#allocation1 + $0x8] sm:$0xff pattern:$0x73625140] }
  0x57   : > { %306 = vst [vmem:[#allocation1] ss:$4 sm:$0xff] %v646_v0 }
  0x5b   : > { %272 = vrot.lane.b32.xlu1 %v264_v25, %s612_s20 }
  0x5c   : > { %274 = vrot.lane.b32.xlu2 %v266_v26, %s612_s20 }
  0x5e   : > { %294 = vrot.lane.b32.xlu0 %v286_v30, %s613_s21  ;;  %v311_v33 = vld.sshfl [vmem:[#allocation1 + $0x10] sm:$0xff pattern:$0x73625140]  ;;  %v307_v34 = vld.sshfl [vmem:[#allocation1] sm:$0xff pattern:$0x73625140] }
  0x5f   : > { %v309_v35 = vld.sshfl [vmem:[#allocation1 + $0x8] sm:$0xff pattern:$0x73625140]  ;;  %v313_v36 = vld.sshfl [vmem:[#allocation1 + $0x18] sm:$0xff pattern:$0x73625140] }
  0x63   : > { %296 = vrot.lane.b32.xlu1 %v288_v32, %s613_s21 }
  0x64   : > { %298 = vrot.lane.b32.xlu2 %v290_v31, %s613_s21 }
  0x66   : > { %319 = vrot.lane.b32.xlu0 %v311_v33, %s614_s22 }
  0x6b   : > { %315 = vrot.lane.b32.xlu1 %v307_v34, %s614_s22 }
  0x6c   : > { %317 = vrot.lane.b32.xlu2 %v309_v35, %s614_s22 }
  0x6e   : > { %321 = vrot.lane.b32.xlu0 %v313_v36, %s614_s22 }
  0x73   : > { %185 = vrot.lane.b32.xlu1 %v664_v9, %s608_s16 }
  0x74   : > { %187 = vrot.lane.b32.xlu2 %v666_v10, %s608_s16 }
  0x76   : > { %165 = vrot.lane.b32.xlu0 %v660_v8, %s607_s15 }
  0x7b   : > { %209 = vrot.lane.b32.xlu1 %v201_v15, %s609_s17  ;;  %v686_v37 = vpop.permute.xlu2 %163 }
  0x7e   : > { %207 = vrot.lane.b32.xlu0 %v199_v14, %s609_s17 }
  0x84   : > { %v688_v38 = vpop.permute.xlu2 %189 }
  0x8d   : > { %v214_v40 = vpop.permute.xlu2 %213 }
  0x92   : > { %v690_v39 = vpop.permute.xlu0 %167  ;;  %v170_v41 = vpop.permute.xlu1 %169 }
  0x93   : > { %v335_v42 = vsel %vm327_vm0, %v655_v4, %v170_v41  ;;  %v174_v46 = vsel %vm171_vm2, %v690_v39, %v170_v41 }
  0x94   : > { %v333_v48 = vsel %vm327_vm0, %v653_v3, %v174_v46 }
  0x9c   : > { %v192_v43 = vpop.permute.xlu0 %191 }
  0x9d   : > { %v344_v44 = vsel %vm336_vm3, %v335_v42, %v192_v43  ;;  %v196_v49 = vsel %vm193_vm4, %v688_v38, %v192_v43 }
  0x9e   : > { %v696_v45 = vsel %vm345_vm1, %v344_v44, %v214_v40  ;;  %v255_v47 = vpop.permute.xlu2 %254  ;;  %v342_v52 = vsel %vm336_vm3, %v333_v48, %v196_v49 }
  0xa4   : > { %v704_v50 = vpop.permute.xlu1 %211 }
  0xa5   : > { %v218_v51 = vsel %vm215_vm5, %v704_v50, %v214_v40 }
  0xa6   : > { %v710_v53 = vsel %vm345_vm1, %v342_v52, %v218_v51  ;;  %v257_v54 = vpop.permute.xlu2 %256 }
  0xa7   : > { %v261_v4 = vsel %vm258_vm6, %v255_v47, %v257_v54 }
  0xad   : > { %v233_v55 = vpop.permute.xlu1 %232 }
  0xae   : > { %v229_v56 = vpop.permute.xlu0 %228  ;;  %v251_v57 = vpop.permute.xlu2 %250 }
  0xb5   : > { %v235_v58 = vpop.permute.xlu1 %234 }
  0xb6   : > { %v275_v62 = vpop.permute.xlu2 %274  ;;  %v239_v5 = vsel %vm236_vm7, %v233_v55, %v235_v58  ;;  %v365_v6 = vsel %vm327_vm0, %v235_v58, %v257_v54 }
  0xb7   : > { %v253_v59 = vpop.permute.xlu0 %252  ;;  %v362_v8 = vsel %vm327_vm0, %v239_v5, %v261_v4 }
  0xb8   : > { %v260_v61 = vsel %vm258_vm6, %v253_v59, %v255_v47  ;;  %v259_v27 = vsel %vm258_vm6, %v251_v57, %v253_v59 }
  0xbd   : > { %v231_v60 = vpop.permute.xlu1 %230 }
  0xbe   : > { %v238_v63 = vsel %vm236_vm7, %v231_v60, %v233_v55  ;;  %v299_v12 = vpop.permute.xlu2 %298  ;;  %v237_v24 = vsel %vm236_vm7, %v229_v56, %v231_v60 }
  0xbf   : > { %v359_v0 = vsel %vm327_vm0, %v238_v63, %v260_v61  ;;  %v356_v29 = vsel %vm327_vm0, %v237_v24, %v259_v27 }
  0xc0   : > { %v277_v3 = vpop.permute.xlu0 %276 }
  0xc1   : > { %v282_v49 = vsel %vm280_vm8, %v275_v62, %v277_v3 }
  0xc5   : > { %v279_v7 = vpop.permute.xlu1 %278 }
  0xc6   : > { %v283_v9 = vsel %vm280_vm8, %v277_v3, %v279_v7  ;;  %v373_v10 = vsel %vm336_vm3, %v365_v6, %v279_v7  ;;  %v318_v20 = vpop.permute.xlu2 %317 }
  0xc7   : > { %v371_v11 = vsel %vm336_vm3, %v362_v8, %v283_v9 }
  0xc8   : > { %v301_v13 = vpop.permute.xlu0 %300 }
  0xc9   : > { %v305_v14 = vsel %vm302_vm9, %v299_v12, %v301_v13  ;;  %v381_v15 = vsel %vm345_vm1, %v373_v10, %v301_v13 }
  0xca   : > { %417 = vrot.lane.b32.xlu2 %v381_v15, %s615_s23  ;;  %v379_v16 = vsel %vm345_vm1, %v371_v11, %v305_v14 }
  0xcb   : > { %415 = vrot.lane.b32.xlu1 %v379_v16, %s615_s23  ;;  %v145_v16 = vld [vmem:[%s798_s1] sm:$0xf] }
  0xcd   : > { %v273_v17 = vpop.permute.xlu1 %272 }
  0xce   : > { %v281_v26 = vsel %vm280_vm8, %v273_v17, %v275_v62  ;;  %v188_v44 = vpop.permute.xlu2 %187 }
  0xcf   : > { %v367_v33 = vsel %vm336_vm3, %v356_v29, %v281_v26  ;;  %v195_v47 = vsel %vm193_vm4, %v188_v44, %v688_v38 }
  0xd0   : > { %v295_v18 = vpop.permute.xlu0 %294 }
  0xd5   : > { %v297_v19 = vpop.permute.xlu1 %296 }
  0xd6   : > { %v303_v28 = vsel %vm302_vm9, %v295_v18, %v297_v19  ;;  %v304_v52 = vsel %vm302_vm9, %v297_v19, %v299_v12 }
  0xd7   : > { %v375_v35 = vsel %vm345_vm1, %v367_v33, %v303_v28 }
  0xd8   : > { %v320_v21 = vpop.permute.xlu0 %319 }
  0xd9   : > { %v325_v22 = vsel %vm323_vm10, %v318_v20, %v320_v21 }
  0xda   : > { %v386_v23 = vsel %vm327_vm0, %v325_v22, 0 }
  0xdb   : > { %421 = vrot.lane.b32.xlu1 %v386_v23, %s615_s23  ;;  %v616_v23 = vmov 0.0  }
  0xdd   : > { %v316_v25 = vpop.permute.xlu1 %315 }
  0xde   : > { %v324_v36 = vsel %vm323_vm10, %v316_v25, %v318_v20 }
  0xdf   : > { %v384_v41 = vsel %vm327_vm0, %v324_v36, 0 }
  0xe0   : > { %v322_v30 = vpop.permute.xlu0 %321 }
  0xe1   : > { %v326_v31 = vsel %vm323_vm10, %v320_v21, %v322_v30  ;;  %v390_v32 = vsel %vm327_vm0, %v322_v30, 0 }
  0xe2   : > { %425 = vrot.lane.b32.xlu0 %v390_v32, %s615_s23  ;;  %v388_v34 = vsel %vm327_vm0, %v326_v31, 0 }
  0xe3   : > { %423 = vrot.lane.b32.xlu2 %v388_v34, %s615_s23  ;;  %411 = vrot.lane.b32.xlu1 %v375_v35, %s615_s23 }
  0xe5   : > { %v186_v40 = vpop.permute.xlu1 %185 }
  0xe6   : > { %v194_v56 = vsel %vm193_vm4, %v186_v40, %v188_v44 }
  0xe8   : > { %v166_v42 = vpop.permute.xlu0 %165 }
  0xe9   : > { %v173_v43 = vsel %vm171_vm2, %v166_v42, %v690_v39 }
  0xea   : > { %419 = vrot.lane.b32.xlu0 %v384_v41, %s615_s23  ;;  %v331_v46 = vsel %vm327_vm0, %v651_v2, %v173_v43  ;;  %v369_v2 = vsel %vm336_vm3, %v359_v0, %v282_v49 }
  0xeb   : > { %407 = vrot.lane.b32.xlu2 %v710_v53, %s615_s23  ;;  %v340_v39 = vsel %vm336_vm3, %v331_v46, %v195_v47  ;;  %v172_v53 = vsel %vm171_vm2, %v686_v37, %v166_v42  ;;  %v377_v38 = vsel %vm345_vm1, %v369_v2, %v304_v52 }
  0xed   : > { %v210_v48 = vpop.permute.xlu1 %209 }
  0xee   : > { %v217_v51 = vsel %vm215_vm5, %v210_v48, %v704_v50  ;;  %v329_v50 = vsel %vm327_vm0, %v649_v1, %v172_v53 }
  0xef   : > { %v349_v54 = vsel %vm345_vm1, %v340_v39, %v217_v51  ;;  %v338_v58 = vsel %vm336_vm3, %v329_v50, %v194_v56 }
  0xf0   : > { %405 = vrot.lane.b32.xlu1 %v349_v54, %s615_s23  ;;  %v208_v55 = vpop.permute.xlu0 %207 }
  0xf1   : > { %v216_v57 = vsel %vm215_vm5, %v208_v55, %v210_v48 }
  0xf2   : > { %409 = vrot.lane.b32.xlu0 %v696_v45, %s615_s23  ;;  %v347_v59 = vsel %vm345_vm1, %v338_v58, %v216_v57 }
  0xf3   : > { %413 = vrot.lane.b32.xlu2 %v377_v38, %s615_s23 }
  0xfa   : > { %403 = vrot.lane.b32.xlu0 %v347_v59, %s615_s23 }
 0x124   : > { %v418_v37 = vpop.permute.xlu2 %417 }
 0x13d   : > { %v424_v45 = vpop.permute.xlu2 %423  ;;  %v416_v60 = vpop.permute.xlu1 %415 }
 0x13e   : > { %v433_v8 = vsel %vm427_vm11, %v416_v60, %v418_v37 }
 0x145   : > { %v408_v61 = vpop.permute.xlu2 %407 }
 0x14d   : > { %v422_v62 = vpop.permute.xlu1 %421  ;;  %v414_v0 = vpop.permute.xlu2 %413 }
 0x14e   : > { %v435_v63 = vsel %vm427_vm11, %v422_v62, %v424_v45  ;;  %v432_v3 = vsel %vm427_vm11, %v414_v0, %v416_v60 }
 0x14f   : > { %v451_v1 = vsel %vm336_vm3, %v435_v63, 0 }
 0x150   : > { %474 = vmatpush.bf16.msra.mxu1 %v451_v1 }
 0x154   : > { %v426_v4 = vpop.permute.xlu0 %425  ;;  %475 = vmatpush.bf16.msra.mxu1 %v432_v3 }
 0x155   : > { %v436_v5 = vsel %vm427_vm11, %v424_v45, %v426_v4  ;;  %v412_v7 = vpop.permute.xlu1 %411 }
 0x156   : > { %v454_v6 = vsel %vm336_vm3, %v436_v5, 0  ;;  %v431_v12 = vsel %vm427_vm11, %v412_v7, %v414_v0 }
 0x157   : > { %487 = vmatpush.bf16.msra.mxu2 %v454_v6 }
 0x15b   : > { %488 = vmatpush.bf16.msra.mxu2 %v433_v8 }
 0x15c   : > { %v420_v9 = vpop.permute.xlu0 %419 }
 0x15d   : > { %v434_v10 = vsel %vm427_vm11, %v420_v9, %v422_v62 }
 0x15e   : > { %v448_v11 = vsel %vm336_vm3, %v434_v10, 0 }
 0x15f   : > { %461 = vmatpush.bf16.msra.mxu0 %v448_v11 }
 0x162   : > { %v406_v13 = vpop.permute.xlu1 %405 }
 0x163   : > { %462 = vmatpush.bf16.msra.mxu0 %v431_v12  ;;  %v429_v14 = vsel %vm427_vm11, %v406_v13, %v408_v61 }
 0x164   : > { %v410_v15 = vpop.permute.xlu0 %409  ;;  %476 = vmatpush.bf16.msra.mxu1 %v429_v14 }
 0x165   : > { %v430_v17 = vsel %vm427_vm11, %v408_v61, %v410_v15 }
 0x166   : > { %489 = vmatpush.bf16.msra.mxu2 %v430_v17 }
 0x167   : > { %572 = vmatmul.msk.bf16.vlgmr.msra.gmra.mxu1 %vm443_vm12, %v145_v16 }
 0x169   : > { %573 = vmatmul.msk.bf16.vlgmr.msra.gmra.mxu2 %vm443_vm12, %v145_v16 }
 0x16c   : > { %v404_v18 = vpop.permute.xlu0 %403 }
 0x16d   : > { %v428_v19 = vsel %vm427_vm11, %v404_v18, %v406_v13 }
 0x16e   : > { %463 = vmatpush.bf16.msra.mxu0 %v428_v19 }
 0x171   : > { %571 = vmatmul.msk.bf16.vlgmr.msra.gmra.mxu0 %vm443_vm12, %v145_v16 }
 0x1e4   : > { %v478_v20 = vpop.f32.mrf.mxu1 }
 0x1e5   : > { %vm496_vm13 = vcmp.ge.f32.partialorder %v478_v20, 2.5 }
 0x1e6   : > { %v575_v24 = vsel %vm496_vm13, 1.0, %v616_v23 }
 0x1ec   : > { %v491_v21 = vpop.f32.mrf.mxu2  ;;  %v480_v22 = vpop.f32.mrf.mxu1 }
 0x1ed   : > { %vm497_vm14 = vcmp.ge.f32.partialorder %v491_v21, 2.5 }
 0x1ee   : > { %v576_v25 = vsel %vm497_vm14, 1.0, %v616_v23  ;;  %v465_v26 = vpop.f32.mrf.mxu0 }
 0x1ef   : > { %v505_v27 = vpack.c.bf16 %v576_v25, %v576_v25  ;;  %vm495_vm15 = vcmp.ge.f32.partialorder %v465_v26, 2.5 }
 0x1f0   : > { %v574_v28 = vsel %vm495_vm15, 1.0, %v616_v23 }
 0x1f1   : > { %507 = vst [vmem:[%s143_s29 + $0x8] sm:$0xf] %v505_v27  ;;  %v504_v29 = vpack.c.bf16 %v575_v24, %v574_v28 }
 0x1f3   : > { %506 = vst [vmem:[%s143_s29] sm:$0xff] %v504_v29 }
 0x1f4   : > { %v493_v30 = vpop.f32.mrf.mxu2 }
 0x1f6   : > { %v467_v31 = vpop.f32.mrf.mxu0 }
 0x1f7 PF: > { %s12_s9 = sadd.s32 1, %s605_s9  }
 0x1f8   : > { %p9_p4 = scmp.ge.s32.totalorder %s12_s9, 4  }
 0x1fa   :  { %11 = sbr.rel (!%p9_p4) target bundleno = 1 (0x1), region = 64 }

</bundles_post_ra>
